<compile_context>
chip_gen: v6e
topology: v6e:2x2x1
jax: 0.10.0
libtpu: 0.0.40
codegen_flags: <defaults>
</compile_context>

<pallas_src>
import math
import numpy as np
import jax
import jax.numpy as jnp
from jax.experimental import pallas as pl
from jax.experimental.pallas import tpu as pltpu

# ---------------- problem sizes (small, consistent with the module) ----------------
B = 8          # batch_size
D = 8          # lstm_input_size (cov_dim)
H = 32         # lstm_hidden_dim
L = 2          # lstm_layers
S = 16         # num_spline

G4 = 4 * H         # 128: LSTM gate width / packed head width (2*S + 1 = 33 <= 128)
LHS_W = 128        # contraction width of every matmul (padded, lane-dense)
X_COL = 2 * H      # 64: x columns in the LHS slab
ONE_COL = 2 * H + D  # 72: constant-1 column (bias folded into the weights)

# state slab layout (B, 4H): [h0 | h1 | c0 | c1], each 32 wide
# heads slab layout (B, G4): [u (0:16) | beta (16:32) | gamma (32) | 0 (33:128)]


# ---------------------------------- kernel ----------------------------------------
def net_kernel(state0_ref, x_ref, w0_ref, wc_ref, wh1_ref,
               heads_ref, state_ref, lhs, cs):
    f32 = jnp.float32
    bf16 = jnp.bfloat16
    t = pl.program_id(0)

    # ---- t == 0: seed the persistent VMEM state from the (B, 4H) init slab ----
    @pl.when(t == 0)
    def _init():
        lhs[:, 0:2 * H] = state0_ref[:, 0:2 * H]          # [h0 | h1]
        cs[...] = state0_ref[:, 2 * H:4 * H]              # [c0 | c1]

    # refresh the [x | 1 | 0-pad] half of the LHS: one aligned 64-lane store
    lhs[:, X_COL:LHS_W] = x_ref[0, :, X_COL:LHS_W]

    def sigmoid(v):
        # tanh identity keeps the divide off the VALU slot (EUP tanh instead)
        return 0.5 * (jnp.tanh(0.5 * v) + 1.0)

    def cell_update(gates, c_prev):
        sg = sigmoid(gates)                               # full-width: i, f, -, o
        tg = jnp.tanh(gates)                              # full-width: -, -, g, -
        i = sg[:, 0:H]
        f = sg[:, H:2 * H]
        g = tg[:, 2 * H:3 * H]
        o = sg[:, 3 * H:4 * H]
        c_new = f * c_prev + i * g
        h_new = o * jnp.tanh(c_new)
        return h_new, c_new

    # ---- layer 0: one fused MXU pass  [h0_prev | x | 1] @ [Whh ; Wih ; b] ----
    g0 = jnp.dot(lhs[...].astype(bf16), w0_ref[...], preferred_element_type=f32)
    h0, c0 = cell_update(g0, cs[:, 0:H])
    cs[:, 0:H] = c0
    lhs[:, 0:H] = h0                                      # in-place h0 update

    # ---- layer 1 gates + heads' (h0 + bias) part: one 256-wide MXU pass ----
    comb = jnp.dot(lhs[...].astype(bf16), wc_ref[...], preferred_element_type=f32)
    g1 = comb[:, 0:G4]
    head = comb[:, G4:2 * G4]
    h1, c1 = cell_update(g1, cs[:, H:2 * H])
    cs[:, H:2 * H] = c1
    lhs[:, H:2 * H] = h1                                  # in-place h1 update

    # ---- heads' h1 correction: tiny 32-deep contraction ----
    head = head + jnp.dot(h1.astype(bf16), wh1_ref[...], preferred_element_type=f32)

    # softmax over pre_u (EXACT normalization: downstream code samples from u)
    pre_u = head[:, 0:S]
    e = jnp.exp(pre_u - jnp.max(pre_u, axis=-1, keepdims=True))
    u = e / jnp.sum(e, axis=-1, keepdims=True)

    # softplus over pre_beta (numerically stable form)
    pre_b = head[:, S:2 * S]
    beta = jnp.maximum(pre_b, 0.0) + jnp.log1p(jnp.exp(-jnp.abs(pre_b)))

    # lane-dense (B, 128) per-step output: [u | beta | gamma | 0...]
    heads_ref[0] = head                                   # gamma at col 2S; cols > 2S are 0
    heads_ref[0, :, 0:S] = u
    heads_ref[0, :, S:2 * S] = beta

    # final h/c written once, on the last step (VMEM-resident until then)
    @pl.when(t == pl.num_programs(0) - 1)
    def _finalize():
        state_ref[:, 0:H] = h0
        state_ref[:, H:2 * H] = h1
        state_ref[:, 2 * H:3 * H] = c0
        state_ref[:, 3 * H:4 * H] = c1


# --------------------- one-time parameter packing (hot-path hoist) -----------------
def prepare_params(params, dtype=jnp.bfloat16):
    (wih0, whh0, bih0, bhh0,
     wih1, whh1, bih1, bhh1,
     wu, bu, wb, bb, wg, bg) = params
    f32 = jnp.float32

    # Column permutation compensating for hidden.permute(1,2,0).view(B, H*L):
    # torch flat index = h*L + l ; kernel LHS index = l*H + h
    perm = np.array([h * L + l for l in range(L) for h in range(H)], dtype=np.int32)

    # layer 0: rows 0:H <- h0_prev, rows 64:72 <- x, row 72 <- bias (ones column)
    w0 = jnp.zeros((LHS_W, G4), f32)
    w0 = w0.at[0:H, :].set(whh0.T.astype(f32))
    w0 = w0.at[X_COL:X_COL + D, :].set(wih0.T.astype(f32))
    w0 = w0.at[ONE_COL, :].set((bih0 + bhh0).astype(f32))

    # fused [layer-1 gates | heads (h0 part + biases)] : (128, 256)
    wu_p = wu[:, perm].T.astype(f32)                      # (2H, S)
    wb_p = wb[:, perm].T.astype(f32)                      # (2H, S)
    wg_p = wg[:, perm].T.astype(f32)                      # (2H, 1)

    wc = jnp.zeros((LHS_W, 2 * G4), f32)
    wc = wc.at[0:H, 0:G4].set(wih1.T.astype(f32))         # layer-1 input = h0_new
    wc = wc.at[H:2 * H, 0:G4].set(whh1.T.astype(f32))     # layer-1 recurrent h1_prev
    wc = wc.at[ONE_COL, 0:G4].set((bih1 + bhh1).astype(f32))
    wc = wc.at[0:H, G4:G4 + S].set(wu_p[0:H])             # heads: h0 contribution only
    wc = wc.at[0:H, G4 + S:G4 + 2 * S].set(wb_p[0:H])
    wc = wc.at[0:H, G4 + 2 * S:G4 + 2 * S + 1].set(wg_p[0:H])
    wc = wc.at[ONE_COL, G4:G4 + S].set(bu.astype(f32))
    wc = wc.at[ONE_COL, G4 + S:G4 + 2 * S].set(bb.astype(f32))
    wc = wc.at[ONE_COL, G4 + 2 * S].set(bg[0].astype(f32))

    # heads' h1 part, applied after h1 is computed: (32, 128)
    wh1 = jnp.zeros((H, G4), f32)
    wh1 = wh1.at[:, 0:S].set(wu_p[H:2 * H])
    wh1 = wh1.at[:, S:2 * S].set(wb_p[H:2 * H])
    wh1 = wh1.at[:, 2 * S:2 * S + 1].set(wg_p[H:2 * H])

    return w0.astype(dtype), wc.astype(dtype), wh1.astype(dtype)


# --------------------------------- wrappers ----------------------------------------
def net_forward_seq(x_seq, hidden, cell, packed_weights):
    """Fused multi-step forward (decode loop inside ONE pallas_call).

    x_seq: (T, B, D), hidden/cell: (L, B, H)
    returns ((u (T,B,S), beta (T,B,S), gamma (T,B)), h (L,B,H), c (L,B,H))
    """
    w0, wc, wh1 = packed_weights
    T = x_seq.shape[0]
    f32 = jnp.float32

    # (B, 4H) init slab: [h0 | h1 | c0 | c1]
    state0 = jnp.concatenate([hidden[0], hidden[1], cell[0], cell[1]],
                             axis=-1).astype(f32)
    # lane-dense per-step x slab: [0 (0:64) | x (64:72) | 1 (72) | 0 (73:128)]
    x_slab = jnp.zeros((T, B, LHS_W), f32)
    x_slab = x_slab.at[:, :, X_COL:X_COL + D].set(x_seq.astype(f32))
    x_slab = x_slab.at[:, :, ONE_COL].set(1.0)

    heads, state = pl.pallas_call(
        net_kernel,
        grid=(T,),
        in_specs=[
            pl.BlockSpec((B, 4 * H), lambda t: (0, 0)),          # init state (read @ t=0)
            pl.BlockSpec((1, B, LHS_W), lambda t: (t, 0, 0)),    # per-step x slab
            pl.BlockSpec((LHS_W, G4), lambda t: (0, 0)),         # w0 (resident)
            pl.BlockSpec((LHS_W, 2 * G4), lambda t: (0, 0)),     # wc (resident)
            pl.BlockSpec((H, G4), lambda t: (0, 0)),             # wh1 (resident)
        ],
        out_specs=(
            pl.BlockSpec((1, B, G4), lambda t: (t, 0, 0)),       # per-step heads
            pl.BlockSpec((B, 4 * H), lambda t: (0, 0)),          # final h/c
        ),
        out_shape=(
            jax.ShapeDtypeStruct((T, B, G4), f32),
            jax.ShapeDtypeStruct((B, 4 * H), f32),
        ),
        scratch_shapes=[
            pltpu.VMEM((B, LHS_W), f32),   # persistent matmul LHS [h0|h1|x|1|pad]
            pltpu.VMEM((B, 2 * H), f32),   # persistent cell state  [c0|c1]
        ],
        compiler_params=pltpu.CompilerParams(
            dimension_semantics=("arbitrary",)),
        cost_estimate=pl.CostEstimate(
            flops=int(2 * T * B * (LHS_W * G4 + LHS_W * 2 * G4 + H * G4)),
            transcendentals=int(T * B * 640),
            bytes_accessed=int((LHS_W * G4 + LHS_W * 2 * G4 + H * G4) * 2
                               + (2 * T * B * LHS_W + 2 * B * 4 * H) * 4),
        ),
    )(state0, x_slab, w0, wc, wh1)

    u = heads[:, :, 0:S]
    beta = heads[:, :, S:2 * S]
    gamma = heads[:, :, 2 * S]
    h_new = jnp.stack([state[:, 0:H], state[:, H:2 * H]])
    c_new = jnp.stack([state[:, 2 * H:3 * H], state[:, 3 * H:4 * H]])
    return (u, beta, gamma), h_new, c_new


def net_forward(x, hidden, cell, packed_weights):
    """Single-step module-semantics forward.
    x: (1,B,D) -> ((u (B,S), beta (B,S), gamma (B,)), h (L,B,H), c (L,B,H))"""
    (u, beta, gamma), h_new, c_new = net_forward_seq(x, hidden, cell, packed_weights)
    return (u[0], beta[0], gamma[0]), h_new, c_new


# ------------------------- deterministic parameter init ---------------------------
def init_params(key):
    ks = jax.random.split(key, 16)
    klstm = 1.0 / math.sqrt(H)

    def u(k, shape, bound):
        return jax.random.uniform(k, shape, jnp.float32, -bound, bound)

    wih0 = u(ks[0], (4 * H, D), klstm)
    whh0 = u(ks[1], (4 * H, H), klstm)
    bih0 = u(ks[2], (4 * H,), klstm).at[H:2 * H].set(1.0)   # forget-gate bias = 1
    bhh0 = u(ks[3], (4 * H,), klstm).at[H:2 * H].set(1.0)
    wih1 = u(ks[4], (4 * H, H), klstm)
    whh1 = u(ks[5], (4 * H, H), klstm)
    bih1 = u(ks[6], (4 * H,), klstm).at[H:2 * H].set(1.0)
    bhh1 = u(ks[7], (4 * H,), klstm).at[H:2 * H].set(1.0)

    klin = 1.0 / math.sqrt(H * L)
    wu = u(ks[8], (S, H * L), klin)
    bu = u(ks[9], (S,), klin)
    wb = u(ks[10], (S, H * L), klin)
    bb = u(ks[11], (S,), klin)
    wg = u(ks[12], (1, H * L), klin)
    bg = u(ks[13], (1,), klin)
    return (wih0, whh0, bih0, bhh0, wih1, whh1, bih1, bhh1,
            wu, bu, wb, bb, wg, bg)


# ------------------------------ pure-JAX reference ---------------------------------
def net_reference(x, hidden, cell, params):
    (wih0, whh0, bih0, bhh0, wih1, whh1, bih1, bhh1,
     wu, bu, wb, bb, wg, bg) = params

    def step(inp, h, c, wih, whh, bih, bhh):
        g = inp @ wih.T + h @ whh.T + bih + bhh
        i = jax.nn.sigmoid(g[:, :H]); f = jax.nn.sigmoid(g[:, H:2 * H])
        gg = jnp.tanh(g[:, 2 * H:3 * H]); o = jax.nn.sigmoid(g[:, 3 * H:])
        c_new = f * c + i * gg
        return o * jnp.tanh(c_new), c_new

    xt = x[0]
    h0, c0 = step(xt, hidden[0], cell[0], wih0, whh0, bih0, bhh0)
    h1, c1 = step(h0, hidden[1], cell[1], wih1, whh1, bih1, bhh1)
    hstack = jnp.stack([h0, h1], axis=0)                    # (L, B, H)
    hperm = jnp.transpose(hstack, (1, 2, 0)).reshape(B, H * L)
    u_ = jax.nn.softmax(hperm @ wu.T + bu, axis=1)
    beta_ = jax.nn.softplus(hperm @ wb.T + bb)
    gamma_ = jnp.squeeze(hperm @ wg.T + bg, axis=-1)
    return (u_, beta_, gamma_), jnp.stack([h0, h1]), jnp.stack([c0, c1])


def net_reference_seq(x_seq, hidden, cell, params):
    h, c = hidden, cell
    us, bs, gs = [], [], []
    for t in range(x_seq.shape[0]):
        (u_, b_, g_), h, c = net_reference(x_seq[t:t + 1], h, c, params)
        us.append(u_); bs.append(b_); gs.append(g_)
    return (jnp.stack(us), jnp.stack(bs), jnp.stack(gs)), h, c


# ------------------------------------ main -----------------------------------------
if __name__ == "__main__":
    key = jax.random.PRNGKey(0)
    kp, kx, kh, kc = jax.random.split(key, 4)

    params = init_params(kp)
    packed = prepare_params(params)             # one-time packing (out of hot path)

    T = 8
    x_seq = jax.random.normal(kx, (T, B, D), jnp.float32)
    hidden = jax.random.normal(kh, (L, B, H), jnp.float32) * 0.1
    cell = jax.random.normal(kc, (L, B, H), jnp.float32) * 0.1

    # --- fused multi-step decode (one pallas_call for all T steps) ---
    fwd_seq = jax.jit(net_forward_seq)
    (u, beta, gamma), h_new, c_new = fwd_seq(x_seq, hidden, cell, packed)
    jax.block_until_ready((u, beta, gamma, h_new, c_new))

    # --- single-step (module forward semantics) ---
    fwd1 = jax.jit(net_forward)
    (u1, beta1, gamma1), h1s, c1s = fwd1(x_seq[0:1], hidden, cell, packed)
    jax.block_until_ready((u1, beta1, gamma1, h1s, c1s))

    # --- references (f32) ---
    (u_r, beta_r, gamma_r), h_r, c_r = net_reference_seq(x_seq, hidden, cell, params)
    (u_r1, beta_r1, gamma_r1), h_r1, c_r1 = net_reference(x_seq[0:1], hidden, cell, params)

    # single-step: tight tolerance (bf16 matmuls, f32 state)
    np.testing.assert_allclose(np.asarray(u1), np.asarray(u_r1), rtol=3e-3, atol=3e-3)
    np.testing.assert_allclose(np.asarray(beta1), np.asarray(beta_r1), rtol=3e-3, atol=3e-3)
    np.testing.assert_allclose(np.asarray(gamma1), np.asarray(gamma_r1), rtol=3e-3, atol=3e-3)
    np.testing.assert_allclose(np.asarray(h1s), np.asarray(h_r1), rtol=3e-3, atol=3e-3)
    np.testing.assert_allclose(np.asarray(c1s), np.asarray(c_r1), rtol=3e-3, atol=3e-3)

    # T-step sequence: slightly looser tolerance (bf16 error accumulates in c over steps)
    np.testing.assert_allclose(np.asarray(u), np.asarray(u_r), rtol=1e-2, atol=1e-2)
    np.testing.assert_allclose(np.asarray(beta), np.asarray(beta_r), rtol=1e-2, atol=1e-2)
    np.testing.assert_allclose(np.asarray(gamma), np.asarray(gamma_r), rtol=1e-2, atol=1e-2)
    np.testing.assert_allclose(np.asarray(h_new), np.asarray(h_r), rtol=1e-2, atol=1e-2)
    np.testing.assert_allclose(np.asarray(c_new), np.asarray(c_r), rtol=1e-2, atol=1e-2)

    # normalization check (exact softmax divide -> rows sum to 1)
    np.testing.assert_allclose(np.asarray(jnp.sum(u, axis=-1)),
                               np.ones((T, B), np.float32), rtol=1e-5, atol=1e-5)

    print("KERNEL_OK")
</pallas_src>

<mosaic_0001>
module attributes {stable_mosaic.version = 11 : i64} {
  func.func @net_kernel(%arg0: i32, %arg1: memref<8x128xf32, #tpu.memory_space<vmem>>, %arg2: memref<1x8x128xf32, #tpu.memory_space<vmem>>, %arg3: memref<128x128xbf16, #tpu.memory_space<vmem>>, %arg4: memref<128x256xbf16, #tpu.memory_space<vmem>>, %arg5: memref<32x128xbf16, #tpu.memory_space<vmem>>, %arg6: memref<1x8x128xf32, #tpu.memory_space<vmem>>, %arg7: memref<8x128xf32, #tpu.memory_space<vmem>>, %arg8: memref<8x128xf32, #tpu.memory_space<vmem>>, %arg9: memref<8x64xf32, #tpu.memory_space<vmem>>) attributes {dimension_semantics = [#tpu.dimension_semantics<arbitrary>], iteration_bounds = array<i64: 8>, scalar_prefetch = 0 : i64, scratch_operands = 2 : i64, tpu.core_type = #tpu.core_type<tc>, window_params = [{pipeline_mode = #tpu.pipeline_mode<synchronous>, transform_indices = @transform_0, window_bounds = array<i64: 8, 128>}, {transform_indices = @transform_1, window_bounds = array<i64: 1, 8, 128>}, {pipeline_mode = #tpu.pipeline_mode<synchronous>, transform_indices = @transform_2, window_bounds = array<i64: 128, 128>}, {pipeline_mode = #tpu.pipeline_mode<synchronous>, transform_indices = @transform_3, window_bounds = array<i64: 128, 256>}, {pipeline_mode = #tpu.pipeline_mode<synchronous>, transform_indices = @transform_4, window_bounds = array<i64: 32, 128>}, {transform_indices = @transform_5, window_bounds = array<i64: 1, 8, 128>}, {pipeline_mode = #tpu.pipeline_mode<synchronous>, transform_indices = @transform_6, window_bounds = array<i64: 8, 128>}]} {
    %c0_i32 = arith.constant 0 : i32
    %0 = arith.cmpi eq, %arg0, %c0_i32 : i32
    %1 = arith.extui %0 : i1 to i32
    %c0_i32_0 = arith.constant 0 : i32
    %2 = arith.cmpi ne, %1, %c0_i32_0 : i32
    scf.if %2 {
      %c0_46 = arith.constant 0 : index
      %c0_47 = arith.constant 0 : index
      %91 = vector.load %arg1[%c0_46, %c0_47] : memref<8x128xf32, #tpu.memory_space<vmem>>, vector<8x64xf32>
      %c0_48 = arith.constant 0 : index
      %c0_49 = arith.constant 0 : index
      %92 = vector.load %arg8[%c0_48, %c0_49] : memref<8x128xf32, #tpu.memory_space<vmem>>, vector<8x64xf32>
      tpu.vector_store %arg8[%c0_48, %c0_49], %91 {strides = array<i32>} : memref<8x128xf32, #tpu.memory_space<vmem>>, vector<8x64xf32>,
      %c0_50 = arith.constant 0 : index
      %c64_51 = arith.constant 64 : index
      %93 = vector.load %arg1[%c0_50, %c64_51] : memref<8x128xf32, #tpu.memory_space<vmem>>, vector<8x64xf32>
      %c0_52 = arith.constant 0 : index
      %c0_53 = arith.constant 0 : index
      %94 = vector.load %arg9[%c0_52, %c0_53] : memref<8x64xf32, #tpu.memory_space<vmem>>, vector<8x64xf32>
      tpu.vector_store %arg9[%c0_52, %c0_53], %93 {strides = array<i32>} : memref<8x64xf32, #tpu.memory_space<vmem>>, vector<8x64xf32>,
    } else {
    }
    %c0 = arith.constant 0 : index
    %c0_1 = arith.constant 0 : index
    %c64 = arith.constant 64 : index
    %3 = vector.load %arg2[%c0, %c0_1, %c64] : memref<1x8x128xf32, #tpu.memory_space<vmem>>, vector<1x8x64xf32>
    %4 = vector.shape_cast %3 : vector<1x8x64xf32> to vector<8x64xf32>
    %c0_2 = arith.constant 0 : index
    %c64_3 = arith.constant 64 : index
    %5 = vector.load %arg8[%c0_2, %c64_3] : memref<8x128xf32, #tpu.memory_space<vmem>>, vector<8x64xf32>
    tpu.vector_store %arg8[%c0_2, %c64_3], %4 {strides = array<i32>} : memref<8x128xf32, #tpu.memory_space<vmem>>, vector<8x64xf32>,
    %c0_4 = arith.constant 0 : index
    %c0_5 = arith.constant 0 : index
    %6 = vector.load %arg8[%c0_4, %c0_5] : memref<8x128xf32, #tpu.memory_space<vmem>>, vector<8x128xf32>
    %7 = arith.truncf %6 : vector<8x128xf32> to vector<8x128xbf16>
    %c0_6 = arith.constant 0 : index
    %c0_7 = arith.constant 0 : index
    %8 = vector.load %arg3[%c0_6, %c0_7] : memref<128x128xbf16, #tpu.memory_space<vmem>>, vector<128x128xbf16>
    %cst = arith.constant dense<0.000000e+00> : vector<8x128xf32>
    %9 = tpu.matmul %7, %8, %cst {dimension_numbers = #tpu.dot_dimension_numbers<[1], [0], [0], [1], [0, 0, 1, 1], [], []>} : vector<8x128xbf16>, vector<128x128xbf16>, vector<8x128xf32> -> vector<8x128xf32>
    %c0_8 = arith.constant 0 : index
    %c0_9 = arith.constant 0 : index
    %10 = vector.load %arg9[%c0_8, %c0_9] : memref<8x64xf32, #tpu.memory_space<vmem>>, vector<8x32xf32>
    %cst_10 = arith.constant 5.000000e-01 : f32
    %11 = vector.broadcast %cst_10 : f32 to vector<8x128xf32>
    %12 = arith.mulf %11, %9 : vector<8x128xf32>
    %13 = math.tanh %12 : vector<8x128xf32>
    %cst_11 = arith.constant 1.000000e+00 : f32
    %14 = vector.broadcast %cst_11 : f32 to vector<8x128xf32>
    %15 = arith.addf %13, %14 : vector<8x128xf32>
    %cst_12 = arith.constant 5.000000e-01 : f32
    %16 = vector.broadcast %cst_12 : f32 to vector<8x128xf32>
    %17 = arith.mulf %16, %15 : vector<8x128xf32>
    %18 = math.tanh %9 : vector<8x128xf32>
    %19 = vector.extract_strided_slice %17 {offsets = [0, 0], sizes = [8, 32], strides = [1, 1]} : vector<8x128xf32> to vector<8x32xf32>
    %20 = vector.extract_strided_slice %17 {offsets = [0, 32], sizes = [8, 32], strides = [1, 1]} : vector<8x128xf32> to vector<8x32xf32>
    %21 = vector.extract_strided_slice %18 {offsets = [0, 64], sizes = [8, 32], strides = [1, 1]} : vector<8x128xf32> to vector<8x32xf32>
    %22 = vector.extract_strided_slice %17 {offsets = [0, 96], sizes = [8, 32], strides = [1, 1]} : vector<8x128xf32> to vector<8x32xf32>
    %23 = arith.mulf %20, %10 : vector<8x32xf32>
    %24 = arith.mulf %19, %21 : vector<8x32xf32>
    %25 = arith.addf %23, %24 : vector<8x32xf32>
    %26 = math.tanh %25 : vector<8x32xf32>
    %27 = arith.mulf %22, %26 : vector<8x32xf32>
    %c0_13 = arith.constant 0 : index
    %c0_14 = arith.constant 0 : index
    %28 = vector.load %arg9[%c0_13, %c0_14] : memref<8x64xf32, #tpu.memory_space<vmem>>, vector<8x32xf32>
    tpu.vector_store %arg9[%c0_13, %c0_14], %25 {strides = array<i32>} : memref<8x64xf32, #tpu.memory_space<vmem>>, vector<8x32xf32>,
    %c0_15 = arith.constant 0 : index
    %c0_16 = arith.constant 0 : index
    %29 = vector.load %arg8[%c0_15, %c0_16] : memref<8x128xf32, #tpu.memory_space<vmem>>, vector<8x32xf32>
    tpu.vector_store %arg8[%c0_15, %c0_16], %27 {strides = array<i32>} : memref<8x128xf32, #tpu.memory_space<vmem>>, vector<8x32xf32>,
    %c0_17 = arith.constant 0 : index
    %c0_18 = arith.constant 0 : index
    %30 = vector.load %arg8[%c0_17, %c0_18] : memref<8x128xf32, #tpu.memory_space<vmem>>, vector<8x128xf32>
    %31 = arith.truncf %30 : vector<8x128xf32> to vector<8x128xbf16>
    %c0_19 = arith.constant 0 : index
    %c0_20 = arith.constant 0 : index
    %32 = vector.load %arg4[%c0_19, %c0_20] : memref<128x256xbf16, #tpu.memory_space<vmem>>, vector<128x256xbf16>
    %cst_21 = arith.constant dense<0.000000e+00> : vector<8x256xf32>
    %33 = tpu.matmul %31, %32, %cst_21 {dimension_numbers = #tpu.dot_dimension_numbers<[1], [0], [0], [1], [0, 0, 1, 1], [], []>} : vector<8x128xbf16>, vector<128x256xbf16>, vector<8x256xf32> -> vector<8x256xf32>
    %34 = vector.extract_strided_slice %33 {offsets = [0, 0], sizes = [8, 128], strides = [1, 1]} : vector<8x256xf32> to vector<8x128xf32>
    %35 = vector.extract_strided_slice %33 {offsets = [0, 128], sizes = [8, 128], strides = [1, 1]} : vector<8x256xf32> to vector<8x128xf32>
    %c0_22 = arith.constant 0 : index
    %c32 = arith.constant 32 : index
    %36 = vector.load %arg9[%c0_22, %c32] : memref<8x64xf32, #tpu.memory_space<vmem>>, vector<8x32xf32>
    %cst_23 = arith.constant 5.000000e-01 : f32
    %37 = vector.broadcast %cst_23 : f32 to vector<8x128xf32>
    %38 = arith.mulf %37, %34 : vector<8x128xf32>
    %39 = math.tanh %38 : vector<8x128xf32>
    %cst_24 = arith.constant 1.000000e+00 : f32
    %40 = vector.broadcast %cst_24 : f32 to vector<8x128xf32>
    %41 = arith.addf %39, %40 : vector<8x128xf32>
    %cst_25 = arith.constant 5.000000e-01 : f32
    %42 = vector.broadcast %cst_25 : f32 to vector<8x128xf32>
    %43 = arith.mulf %42, %41 : vector<8x128xf32>
    %44 = math.tanh %34 : vector<8x128xf32>
    %45 = vector.extract_strided_slice %43 {offsets = [0, 0], sizes = [8, 32], strides = [1, 1]} : vector<8x128xf32> to vector<8x32xf32>
    %46 = vector.extract_strided_slice %43 {offsets = [0, 32], sizes = [8, 32], strides = [1, 1]} : vector<8x128xf32> to vector<8x32xf32>
    %47 = vector.extract_strided_slice %44 {offsets = [0, 64], sizes = [8, 32], strides = [1, 1]} : vector<8x128xf32> to vector<8x32xf32>
    %48 = vector.extract_strided_slice %43 {offsets = [0, 96], sizes = [8, 32], strides = [1, 1]} : vector<8x128xf32> to vector<8x32xf32>
    %49 = arith.mulf %46, %36 : vector<8x32xf32>
    %50 = arith.mulf %45, %47 : vector<8x32xf32>
    %51 = arith.addf %49, %50 : vector<8x32xf32>
    %52 = math.tanh %51 : vector<8x32xf32>
    %53 = arith.mulf %48, %52 : vector<8x32xf32>
    %c0_26 = arith.constant 0 : index
    %c32_27 = arith.constant 32 : index
    %54 = vector.load %arg9[%c0_26, %c32_27] : memref<8x64xf32, #tpu.memory_space<vmem>>, vector<8x32xf32>
    tpu.vector_store %arg9[%c0_26, %c32_27], %51 {strides = array<i32>} : memref<8x64xf32, #tpu.memory_space<vmem>>, vector<8x32xf32>,
    %c0_28 = arith.constant 0 : index
    %c32_29 = arith.constant 32 : index
    %55 = vector.load %arg8[%c0_28, %c32_29] : memref<8x128xf32, #tpu.memory_space<vmem>>, vector<8x32xf32>
    tpu.vector_store %arg8[%c0_28, %c32_29], %53 {strides = array<i32>} : memref<8x128xf32, #tpu.memory_space<vmem>>, vector<8x32xf32>,
    %56 = arith.truncf %53 : vector<8x32xf32> to vector<8x32xbf16>
    %c0_30 = arith.constant 0 : index
    %c0_31 = arith.constant 0 : index
    %57 = vector.load %arg5[%c0_30, %c0_31] : memref<32x128xbf16, #tpu.memory_space<vmem>>, vector<32x128xbf16>
    %cst_32 = arith.constant dense<0.000000e+00> : vector<8x128xf32>
    %58 = tpu.matmul %56, %57, %cst_32 {dimension_numbers = #tpu.dot_dimension_numbers<[1], [0], [0], [1], [0, 0, 1, 1], [], []>} : vector<8x32xbf16>, vector<32x128xbf16>, vector<8x128xf32> -> vector<8x128xf32>
    %59 = arith.addf %35, %58 : vector<8x128xf32>
    %60 = vector.extract_strided_slice %59 {offsets = [0, 0], sizes = [8, 16], strides = [1, 1]} : vector<8x128xf32> to vector<8x16xf32>
    %cst_33 = arith.constant dense<0xFF800000> : vector<8xf32>
    %61 = vector.multi_reduction <maximumf>, %60, %cst_33 [1] : vector<8x16xf32> to vector<8xf32>
    %62 = vector.shape_cast %61 : vector<8xf32> to vector<8x1xf32>
    %63 = vector.broadcast %62 : vector<8x1xf32> to vector<8x16xf32>
    %64 = arith.subf %60, %63 : vector<8x16xf32>
    %65 = math.exp %64 : vector<8x16xf32>
    %cst_34 = arith.constant dense<0.000000e+00> : vector<8xf32>
    %66 = vector.multi_reduction <add>, %65, %cst_34 [1] : vector<8x16xf32> to vector<8xf32>
    %67 = vector.shape_cast %66 : vector<8xf32> to vector<8x1xf32>
    %68 = vector.broadcast %67 : vector<8x1xf32> to vector<8x16xf32>
    %69 = arith.divf %65, %68 : vector<8x16xf32>
    %70 = vector.extract_strided_slice %59 {offsets = [0, 16], sizes = [8, 16], strides = [1, 1]} : vector<8x128xf32> to vector<8x16xf32>
    %cst_35 = arith.constant 0.000000e+00 : f32
    %71 = vector.broadcast %cst_35 : f32 to vector<8x16xf32>
    %72 = arith.maximumf %70, %71 : vector<8x16xf32>
    %73 = math.absf %70 : vector<8x16xf32>
    %cst_36 = arith.constant 0.000000e+00 : f32
    %74 = vector.broadcast %cst_36 : f32 to vector<8x16xf32>
    %75 = arith.subf %74, %73 : vector<8x16xf32>
    %76 = math.exp %75 : vector<8x16xf32>
    %77 = math.log1p %76 : vector<8x16xf32>
    %78 = arith.addf %72, %77 : vector<8x16xf32>
    %c0_37 = arith.constant 0 : index
    %c0_38 = arith.constant 0 : index
    %c0_39 = arith.constant 0 : index
    %79 = vector.load %arg6[%c0_37, %c0_38, %c0_39] : memref<1x8x128xf32, #tpu.memory_space<vmem>>, vector<1x8x128xf32>
    %80 = vector.shape_cast %79 : vector<1x8x128xf32> to vector<8x128xf32>
    %81 = vector.shape_cast %59 : vector<8x128xf32> to vector<1x8x128xf32>
    tpu.vector_store %arg6[%c0_37, %c0_38, %c0_39], %81 {strides = array<i32>} : memref<1x8x128xf32, #tpu.memory_space<vmem>>, vector<1x8x128xf32>,
    %c0_40 = arith.constant 0 : index
    %c0_41 = arith.constant 0 : index
    %c0_42 = arith.constant 0 : index
    %82 = vector.load %arg6[%c0_40, %c0_41, %c0_42] : memref<1x8x128xf32, #tpu.memory_space<vmem>>, vector<1x8x16xf32>
    %83 = vector.shape_cast %82 : vector<1x8x16xf32> to vector<8x16xf32>
    %84 = vector.shape_cast %69 : vector<8x16xf32> to vector<1x8x16xf32>
    tpu.vector_store %arg6[%c0_40, %c0_41, %c0_42], %84 {strides = array<i32>} : memref<1x8x128xf32, #tpu.memory_space<vmem>>, vector<1x8x16xf32>,
    %c0_43 = arith.constant 0 : index
    %c0_44 = arith.constant 0 : index
    %c16 = arith.constant 16 : index
    %85 = vector.load %arg6[%c0_43, %c0_44, %c16] : memref<1x8x128xf32, #tpu.memory_space<vmem>>, vector<1x8x16xf32>
    %86 = vector.shape_cast %85 : vector<1x8x16xf32> to vector<8x16xf32>
    %87 = vector.shape_cast %78 : vector<8x16xf32> to vector<1x8x16xf32>
    tpu.vector_store %arg6[%c0_43, %c0_44, %c16], %87 {strides = array<i32>} : memref<1x8x128xf32, #tpu.memory_space<vmem>>, vector<1x8x16xf32>,
    %c7_i32 = arith.constant 7 : i32
    %88 = arith.cmpi eq, %arg0, %c7_i32 : i32
    %89 = arith.extui %88 : i1 to i32
    %c0_i32_45 = arith.constant 0 : i32
    %90 = arith.cmpi ne, %89, %c0_i32_45 : i32
    scf.if %90 {
      %c0_46 = arith.constant 0 : index
      %c0_47 = arith.constant 0 : index
      %91 = vector.load %arg7[%c0_46, %c0_47] : memref<8x128xf32, #tpu.memory_space<vmem>>, vector<8x32xf32>
      tpu.vector_store %arg7[%c0_46, %c0_47], %27 {strides = array<i32>} : memref<8x128xf32, #tpu.memory_space<vmem>>, vector<8x32xf32>,
      %c0_48 = arith.constant 0 : index
      %c32_49 = arith.constant 32 : index
      %92 = vector.load %arg7[%c0_48, %c32_49] : memref<8x128xf32, #tpu.memory_space<vmem>>, vector<8x32xf32>
      tpu.vector_store %arg7[%c0_48, %c32_49], %53 {strides = array<i32>} : memref<8x128xf32, #tpu.memory_space<vmem>>, vector<8x32xf32>,
      %c0_50 = arith.constant 0 : index
      %c64_51 = arith.constant 64 : index
      %93 = vector.load %arg7[%c0_50, %c64_51] : memref<8x128xf32, #tpu.memory_space<vmem>>, vector<8x32xf32>
      tpu.vector_store %arg7[%c0_50, %c64_51], %25 {strides = array<i32>} : memref<8x128xf32, #tpu.memory_space<vmem>>, vector<8x32xf32>,
      %c0_52 = arith.constant 0 : index
      %c96 = arith.constant 96 : index
      %94 = vector.load %arg7[%c0_52, %c96] : memref<8x128xf32, #tpu.memory_space<vmem>>, vector<8x32xf32>
      tpu.vector_store %arg7[%c0_52, %c96], %51 {strides = array<i32>} : memref<8x128xf32, #tpu.memory_space<vmem>>, vector<8x32xf32>,
    } else {
    }
    return
  }
  func.func @transform_0(%arg0: i32) -> (i32, i32) {
    %c0_i32 = arith.constant 0 : i32
    %c0_i32_0 = arith.constant 0 : i32
    %c0_i32_1 = arith.constant 0 : i32
    return %c0_i32, %c0_i32_0 : i32, i32
  }
  func.func @transform_1(%arg0: i32) -> (i32, i32, i32) {
    %c0_i32 = arith.constant 0 : i32
    %c0_i32_0 = arith.constant 0 : i32
    %c0_i32_1 = arith.constant 0 : i32
    return %arg0, %c0_i32, %c0_i32_0 : i32, i32, i32
  }
  func.func @transform_2(%arg0: i32) -> (i32, i32) {
    %c0_i32 = arith.constant 0 : i32
    %c0_i32_0 = arith.constant 0 : i32
    %c0_i32_1 = arith.constant 0 : i32
    return %c0_i32, %c0_i32_0 : i32, i32
  }
  func.func @transform_3(%arg0: i32) -> (i32, i32) {
    %c0_i32 = arith.constant 0 : i32
    %c0_i32_0 = arith.constant 0 : i32
    %c0_i32_1 = arith.constant 0 : i32
    return %c0_i32, %c0_i32_0 : i32, i32
  }
  func.func @transform_4(%arg0: i32) -> (i32, i32) {
    %c0_i32 = arith.constant 0 : i32
    %c0_i32_0 = arith.constant 0 : i32
    %c0_i32_1 = arith.constant 0 : i32
    return %c0_i32, %c0_i32_0 : i32, i32
  }
  func.func @transform_5(%arg0: i32) -> (i32, i32, i32) {
    %c0_i32 = arith.constant 0 : i32
    %c0_i32_0 = arith.constant 0 : i32
    %c0_i32_1 = arith.constant 0 : i32
    return %arg0, %c0_i32, %c0_i32_0 : i32, i32, i32
  }
  func.func @transform_6(%arg0: i32) -> (i32, i32) {
    %c0_i32 = arith.constant 0 : i32
    %c0_i32_0 = arith.constant 0 : i32
    %c0_i32_1 = arith.constant 0 : i32
    return %c0_i32, %c0_i32_0 : i32, i32
  }
}

</mosaic_0001>

<bundles_post_ra>
// kernel: net_forward_seq.1
= control target key start
LH: loop header
LB: loop body
LE: loop exit
PB: predicated region body
PF: predicated region fallthrough
CT: control target
= control target key end

     0   :  { %s947_s21 = smov 0   ;;  %s1116_s0 = inlined_call_operand.vmem [shape: f32[8,128], index: 0, kind: input, shape index: {}]   ;;  %s1117_s1 = inlined_call_operand.vmem [shape: f32[8,8,128], index: 1, kind: input, shape index: {}]   ;;  %s1118_s2 = inlined_call_operand.vmem [shape: bf16[128,128], index: 2, kind: input, shape index: {}]   ;;  %s1119_s3 = inlined_call_operand.vmem [shape: bf16[128,256], index: 3, kind: input, shape index: {}]   ;;  %s1120_s4 = inlined_call_operand.vmem [shape: bf16[32,128], index: 4, kind: input, shape index: {}]   ;;  %s1121_s5 = inlined_call_operand.vmem [shape: f32[8,8,128], index: 5, kind: output, shape index: {0}]   ;;  %s1122_s6 = inlined_call_operand.vmem [shape: f32[8,128], index: 6, kind: output, shape index: {1}]  }
   0x1 LB: > { %s953_s22 = sadd.s32 4294967295, %s901_s21   ;;  %p750_p0 = scmp.ge.s32.totalorder %s901_s21, 1  ;;  %s901_s21 = sphi %s947_s21, %s17_s21  }
   0x2   : > { %p209_p1 = scmp.lt.s32.totalorder %s901_s21, 9 }
   0x4   : > { %p210_p2 = pnand %p750_p0, %p209_p1 }
   0x5   : > { %p237_p3 = scmp.lt.s32.totalorder (!%p210_p2), %s953_s22, 7  ;;  %p753_p4 = scmp.ne.s32.totalorder (!%p210_p2), %s953_s22, 0 }
   0x6   : > { %213 = sbr.rel (%p210_p2) target bundleno = 2182 (0x886), region = 40 }
   0xb   : > { %s238_s23 = scalar_select %p237_p3, %s953_s22, 7 }
   0xc   : > { %249 = sbr.rel (%p753_p4) target bundleno = 134 (0x86), region = 44  ;;  %s903_s9 = smov (!%p753_p4), 64  }
   0xd   : > { %s751_s24 = sshll.u32 %s238_s23, 3 }
   0xe   : > { %s240_s27 = scalar_lea.vmem %s1117_s1, %s751_s24  ;;  %s965_s30 = scalar_lea.vmem %s1121_s5, %s751_s24 }
  0x11   : > { %v253_v0 = vld [vmem:[%s1116_s0] sm:$0xff]  ;;  %vm251_vm0 = vcmask 523264  }
  0x12   : > { %255 = vrot.lane.b32.xlu0 %v253_v0, %s903_s9  ;;  %252 = vst.msk [vmem:[#allocation2] sm:$0xff] %vm251_vm0, %v253_v0 }
  0x84   : > { %v256_v1 = vpop.permute.xlu0 %255 }
  0x85   : > { %258 = vst.msk [vmem:[#allocation3] sm:$0xff] %vm251_vm0, %v256_v1 }
  0x86 PF: > { %v841_v2 = vld [vmem:[%s1118_s2 + $0x38] sm:$0xff]   ;;  %v904_v3 = vmov 0.0   ;;  %v842_v4 = vld [vmem:[%s1118_s2 + $0x30] sm:$0xff]   ;;  %vm905_vm1 = vmmov 0   ;;  %v843_v5 = vld [vmem:[%s1118_s2 + $0x28] sm:$0xff]   ;;  %vm260_vm2 = vcmask 1048064  }
  0x87   : > { %796 = vmatprep.subr.bf16.mxu0 %v904_v3  ;;  %812 = vmatprep.mubr.msk.bf16.mxu0 %vm905_vm1, %v904_v3  ;;  %v844_v6 = vld [vmem:[%s1118_s2 + $0x20] sm:$0xff]   ;;  %v845_v8 = vld [vmem:[%s1118_s2 + $0x18] sm:$0xff]   ;;  %v846_v9 = vld [vmem:[%s1118_s2 + $0x10] sm:$0xff]   ;;  %s906_s28 = smov 64   ;;  %s907_s29 = smov 32   ;;  %v908_v47 = vmov 0  }
  0x88   : > { %797 = vmatpush3.bf16.msra.mxu0 %v841_v2  ;;  %v259_v7 = vld [vmem:[%s240_s27] sm:$0xff]  ;;  %v847_v10 = vld [vmem:[%s1118_s2 + $0x8] sm:$0xff]   ;;  %v849_v30 = vld [vmem:[%s1119_s3 + $0x74] ss:$8 sps:$4 sm:$0xff]   ;;  %536 = vmatprep.mubr.bf16.mxu1 %v908_v47  ;;  %s909_s20 = smov 96   ;;  %vm399_vm3 = vcmask 261120  }
  0x89   : > { %798 = vmatprep.subr.bf16.mxu0 %v904_v3  ;;  %261 = vst.msk [vmem:[#allocation2] sm:$0xff] %vm260_vm2, %v259_v7  ;;  %v848_v11 = vld [vmem:[%s1118_s2] sm:$0xff]   ;;  %v851_v31 = vld [vmem:[%s1119_s3 + $0x70] ss:$8 sps:$4 sm:$0xff]   ;;  %504 = vmatprep.subr.bf16.mxu1 %v849_v30  ;;  %v855_v34 = vld [vmem:[%s1119_s3 + $0x54] ss:$8 sps:$4 sm:$0xff]  }
  0x8a   : > { %v852_v32 = vld [vmem:[%s1119_s3 + $0x64] ss:$8 sps:$4 sm:$0xff]   ;;  %505 = vmatpush1.bf16.msra.mxu1 %v851_v31  ;;  %v854_v33 = vld [vmem:[%s1119_s3 + $0x60] ss:$8 sps:$4 sm:$0xff]   ;;  %v857_v36 = vld [vmem:[%s1119_s3 + $0x50] ss:$8 sps:$4 sm:$0xff]  }
  0x8b   : > { %506 = vmatprep.subr.bf16.mxu1 %v852_v32  ;;  %v858_v37 = vld [vmem:[%s1119_s3 + $0x44] ss:$8 sps:$4 sm:$0xff]   ;;  %v860_v38 = vld [vmem:[%s1119_s3 + $0x40] ss:$8 sps:$4 sm:$0xff]   ;;  %v861_v39 = vld [vmem:[%s1119_s3 + $0x34] ss:$8 sps:$4 sm:$0xff]  }
  0x8c   : > { %799 = vmatpush3.bf16.msra.mxu0 %v842_v4  ;;  %v368_v19 = vld [vmem:[#allocation3] sm:$0xff]  ;;  %v863_v40 = vld [vmem:[%s1119_s3 + $0x30] ss:$8 sps:$4 sm:$0xff]   ;;  %v867_v43 = vld [vmem:[%s1119_s3 + $0x14] ss:$8 sps:$4 sm:$0xff]   ;;  %vm568_vm4 = vcmask 523520  }
  0x8d   : > { %800 = vmatprep.subr.bf16.mxu0 %v904_v3  ;;  %v864_v41 = vld [vmem:[%s1119_s3 + $0x24] ss:$8 sps:$4 sm:$0xff]   ;;  %v866_v42 = vld [vmem:[%s1119_s3 + $0x20] ss:$8 sps:$4 sm:$0xff]   ;;  %v869_v44 = vld [vmem:[%s1119_s3 + $0x10] ss:$8 sps:$4 sm:$0xff]  }
  0x8e   : > { %507 = vmatpush1.bf16.msra.mxu1 %v854_v33  ;;  %v870_v45 = vld [vmem:[%s1119_s3 + $0x4] ss:$8 sps:$4 sm:$0xff]   ;;  %v872_v46 = vld [vmem:[%s1119_s3] ss:$8 sps:$4 sm:$0xff]   ;;  %vm639_vm5 = vcmask 130048   ;;  %vm668_vm7 = vcmask 261248  }
  0x8f   : > { %508 = vmatprep.subr.bf16.mxu1 %v855_v34  ;;  %v874_v7 = vld [vmem:[%s1120_s4] sm:$0xff]   ;;  %p781_p5 = scmp.ne.s32.totalorder %s953_s22, 7 }
  0x90   : > { %801 = vmatpush3.bf16.msra.mxu0 %v843_v5  ;;  %v262_v12 = vld [vmem:[#allocation2] sm:$0xff]  ;;  %s910_s27 = smov (!%p781_p5), 32   ;;  %s911_s9 = smov (!%p781_p5), 64  }
  0x91   : > { %802 = vmatprep.subr.bf16.mxu0 %v904_v3  ;;  %v263_v13 = vpack.c.bf16 %v262_v12, %v262_v12 }
  0x92   : > { %509 = vmatpush1.bf16.msra.mxu1 %v857_v36 }
  0x93   : > { %510 = vmatprep.subr.bf16.mxu1 %v858_v37 }
  0x94   : > { %803 = vmatpush3.bf16.msra.mxu0 %v844_v6  ;;  %v873_v6 = vld [vmem:[%s1120_s4 + $0x8] sm:$0xff]  }
  0x95   : > { %804 = vmatprep.subr.bf16.mxu0 %v904_v3 }
  0x96   : > { %511 = vmatpush1.bf16.msra.mxu1 %v860_v38 }
  0x97   : > { %512 = vmatprep.subr.bf16.mxu1 %v861_v39 }
  0x98   : > { %805 = vmatpush3.bf16.msra.mxu0 %v845_v8 }
  0x99   : > { %806 = vmatprep.subr.bf16.mxu0 %v904_v3 }
  0x9a   : > { %513 = vmatpush1.bf16.msra.mxu1 %v863_v40 }
  0x9b   : > { %514 = vmatprep.subr.bf16.mxu1 %v864_v41 }
  0x9c   : > { %807 = vmatpush3.bf16.msra.mxu0 %v846_v9 }
  0x9d   : > { %808 = vmatprep.subr.bf16.mxu0 %v904_v3 }
  0x9e   : > { %515 = vmatpush1.bf16.msra.mxu1 %v866_v42 }
  0x9f   : > { %516 = vmatprep.subr.bf16.mxu1 %v867_v43 }
  0xa0   : > { %809 = vmatpush3.bf16.msra.mxu0 %v847_v10 }
  0xa1   : > { %810 = vmatprep.subr.bf16.mxu0 %v904_v3 }
  0xa2   : > { %517 = vmatpush1.bf16.msra.mxu1 %v869_v44 }
  0xa3   : > { %518 = vmatprep.subr.bf16.mxu1 %v870_v45 }
  0xa4   : > { %811 = vmatpush3.bf16.msra.mxu0 %v848_v11 }
  0xa5   : > { %816 = vmatprep.subr.bf16.mxu0 %v904_v3 }
  0xa6   : > { %519 = vmatpush1.bf16.msra.mxu1 %v872_v46 }
  0xa7   : > { %813 = vmatmul.mubr.bf16.vlgmr.msra.gmra.mxu0 %v263_v13 }
  0xa8   : > { %820 = vmatprep.mubr.msk.bf16.mxu0 %vm905_vm1, %v904_v3  ;;  %817 = vmatpush3.bf16.msra.mxu0 %v873_v6 }
  0xa9   : > { %818 = vmatprep.subr.bf16.mxu0 %v904_v3 }
  0xac   : > { %819 = vmatpush3.bf16.msra.mxu0 %v874_v7 }
 0x167   : > { %v362_v14 = vpop.f32.mrf.mxu0 }
 0x168   : > { %875 = vtanh.f32 %v362_v14  ;;  %v369_v20 = vmul.f32 0.5, %v362_v14 }
 0x169   : > { %v814_v15 = vpop.f32.mrf.mxu0 }
 0x16a   : > { %877 = vtanh.f32 %v369_v20 }
 0x16b   : > { %v365_v16 = vpop.f32.mrf.mxu0 }
 0x16d   : > { %v815_v17 = vpop.f32.mrf.mxu0 }
 0x175   : > { %v876_v18 = vpop.eup %875 }
 0x176   : > { %380 = vrot.lane.b32.xlu0 %v876_v18, %s906_s28 }
 0x177   : > { %v878_v21 = vpop.eup %877 }
 0x178   : > { %v371_v22 = vadd.f32 1.0, %v878_v21 }
 0x17a   : > { %375 = vrot.lane.b32.xlu0 %v368_v19, %s907_s29  ;;  %v372_v23 = vmul.f32 0.5, %v371_v22 }
 0x1e8   : > { %v381_v24 = vpop.permute.xlu0 %380 }
 0x1e9   : > { %v383_v25 = vmul.f32 %v381_v24, %v372_v23 }
 0x1eb   : > { %385 = vrot.lane.b32.xlu1 %v383_v25, %s907_s29 }
 0x1ec   : > { %v376_v26 = vpop.permute.xlu0 %375 }
 0x1ed   : > { %v378_v27 = vmul.f32 %v376_v26, %v372_v23 }
 0x25d   : > { %v386_v28 = vpop.permute.xlu1 %385 }
 0x25e   : > { %v1011_v29 = vadd.f32 %v386_v28, %v378_v27 }
 0x260   : > { %879 = vtanh.f32 %v1011_v29 }
 0x26d   : > { %v880_v35 = vpop.eup %879 }
 0x26e   : > { %391 = vrot.lane.b32.xlu1 %v880_v35, %s906_s28 }
 0x2e0   : > { %v392_v48 = vpop.permute.xlu1 %391 }
 0x2e1   : > { %v394_v49 = vmul.f32 %v392_v48, %v372_v23 }
 0x2e3   : > { %402 = vrot.lane.b32.xlu0 %v394_v49, %s907_s29 }
 0x2e7   : > { %396 = vrot.lane.b32.xlu0 %v1011_v29, %s909_s20 }
 0x355   : > { %v1065_v50 = vpop.permute.xlu0 %402 }
 0x356   : > { %405 = vst.msk [vmem:[#allocation2] sm:$0xff] %vm399_vm3, %v1065_v50 }
 0x359   : > { %v397_v51 = vpop.permute.xlu0 %396 }
 0x35a   : > { %400 = vst.msk [vmem:[#allocation3] sm:$0xff] %vm399_vm3, %v397_v51 }
 0x35d   : > { %v406_v52 = vld [vmem:[#allocation2] sm:$0xff] }
 0x35e   : > { %v407_v53 = vpack.c.bf16 %v406_v52, %v406_v52 }
 0x360   : > { %537 = vmatmul.mubr.bf16.vlgmr.msra.gmra.mxu1 %v407_v53 }
 0x361   : > { %v545_v1 = vld [vmem:[#allocation3] sm:$0xff] }
 0x420   : > { %v538_v54 = vpop.f32.mrf.mxu1 }
 0x421   : > { %881 = vtanh.f32 %v538_v54  ;;  %v546_v59 = vmul.f32 0.5, %v538_v54 }
 0x422   : > { %v540_v55 = vpop.f32.mrf.mxu1 }
 0x423   : > { %883 = vtanh.f32 %v546_v59 }
 0x424   : > { %v542_v56 = vpop.f32.mrf.mxu1 }
 0x426   : > { %v543_v57 = vpop.f32.mrf.mxu1 }
 0x42e   : > { %v882_v58 = vpop.eup %881 }
 0x42f   : > { %553 = vrot.lane.b32.xlu1 %v882_v58, %s906_s28 }
 0x430   : > { %v884_v60 = vpop.eup %883 }
 0x431   : > { %v548_v61 = vadd.f32 1.0, %v884_v60 }
 0x433   : > { %v549_v62 = vmul.f32 0.5, %v548_v61 }
 0x435   : > { %v551_v2 = vmul.f32 %v549_v62, %v545_v1 }
 0x4a1   : > { %v554_v63 = vpop.permute.xlu1 %553 }
 0x4a2   : > { %v556_v0 = vmul.f32 %v554_v63, %v549_v62 }
 0x4a4   : > { %558 = vrot.lane.b32.xlu1 %v556_v0, %s907_s29 }
 0x516   : > { %v559_v4 = vpop.permute.xlu1 %558 }
 0x517   : > { %v1072_v5 = vadd.f32 %v559_v4, %v551_v2 }
 0x519   : > { %885 = vtanh.f32 %v1072_v5  ;;  %569 = vst.msk [vmem:[#allocation3] sm:$0xff] %vm568_vm4, %v1072_v5 }
 0x526   : > { %v886_v8 = vpop.eup %885 }
 0x527   : > { %564 = vrot.lane.b32.xlu0 %v886_v8, %s906_s28 }
 0x599   : > { %v565_v9 = vpop.permute.xlu0 %564 }
 0x59a   : > { %v567_v10 = vmul.f32 %v565_v9, %v549_v62 }
 0x59c   : > { %v575_v11 = vpack.c.bf16 %v567_v10, %v567_v10 }
 0x59e   : > { %581 = vrot.lane.b32.xlu1 %v575_v11, %s907_s29 }
 0x610   : > { %v582_v12 = vpop.permute.xlu1 %581 }
 0x611   : > { %821 = vmatmul.mubr.msk.bf16.vlgmr.msra.gmra.mxu0 %vm399_vm3, %v582_v12 }
 0x6d1   : > { %v632_v13 = vpop.f32.mrf.mxu0 }
 0x6d2   : > { %v638_v14 = vadd.f32 %v632_v13, %v540_v55 }
 0x6d3   : > { %v822_v15 = vpop.f32.mrf.mxu0 }
 0x6d4   : > { %666 = vst [vmem:[%s965_s30] sm:$0xff] %v638_v14  ;;  %v640_v16 = vsel %vm639_vm5, %v638_v14, -inf  ;;  %v652_v24 = vand.u32 2147483647, %v638_v14  ;;  %v651_v39 = vmax.f32 %v638_v14, 0.0 }
 0x6d5   : > { %641 = vmax.xlane.f32.xlu0 %v640_v16  ;;  %v635_v3 = vpop.f32.mrf.mxu0 }
 0x6d6   : > { %v653_v25 = vsub.f32 0.0, %v652_v24 }
 0x6d7   : > { %v823_v17 = vpop.f32.mrf.mxu0 }
 0x6d8   : > { %v654_v26 = vmul.f32 1.442695, %v653_v25 }
 0x6eb   : > { %571 = vrot.lane.b32.xlu0 %v567_v10, %s906_s28 }
 0x75e   : > { %v642_v18 = vpop.xlane.xlu0 %641 }
 0x75f   : > { %v643_v19 = vsub.f32 %v638_v14, %v642_v18 }
 0x761   : > { %v644_v20 = vmul.f32 1.442695, %v643_v19 }
 0x762   : > { %v572_v21 = vpop.permute.xlu0 %571 }
 0x763   : > { %887 = vpow2.f32 %v644_v20  ;;  %574 = vst.msk [vmem:[#allocation2] sm:$0xff] %vm568_vm4, %v572_v21 }
 0x764   : > { %889 = vpow2.f32 %v654_v26 }
 0x770   : > { %v888_v22 = vpop.eup %887 }
 0x771   : > { %v646_v23 = vsel %vm639_vm5, %v888_v22, 0.0  ;;  %v890_v27 = vpop.eup %889 }
 0x772   : > { %647 = vadd.xlane.f32.xlu1 %v646_v23  ;;  %v656_v28 = vadd.f32 1.0, %v890_v27  ;;  %v659_v31 = vmul.f32 -0.5, %v890_v27  ;;  %v662_v34 = vand.u32 2147483647, %v890_v27 }
 0x774   : > { %891 = vlog2.f32 %v656_v28  ;;  %v660_v33 = vadd.f32 1.0, %v659_v31  ;;  %vm663_vm6 = vcmp.lt.f32.partialorder %v662_v34, 0.0004427343 }
 0x776   : > { %v661_v36 = vmul.f32 %v890_v27, %v660_v33 }
 0x781   : > { %v892_v32 = vpop.eup %891 }
 0x782   : > { %v658_v35 = vmul.f32 0.6931472, %v892_v32 }
 0x784   : > { %v664_v37 = vsel %vm663_vm6, %v661_v36, %v658_v35 }
 0x785   : > { %v665_v41 = vadd.f32 %v664_v37, %v651_v39 }
 0x7fb   : > { %v648_v30 = vpop.xlane.xlu1 %647 }
 0x7fc   : > { %893 = vrcp.f32 %v648_v30 }
 0x809   : > { %v894_v38 = vpop.eup %893  ;;  %673 = sbr.rel (%p781_p5) target bundleno = 2182 (0x886), region = 48 }
 0x80a   : > { %v650_v40 = vmul.f32 %v894_v38, %v888_v22 }
 0x80c   : > { %667 = vst.msk [vmem:[%s965_s30] sm:$0xff] %vm639_vm5, %v650_v40 }
 0x80d   : > { %669 = vst.msk [vmem:[%s965_s30] sm:$0xff] %vm668_vm7, %v665_v41 }
 0x80e   : > { %674 = vst.msk [vmem:[%s1122_s6] sm:$0xff] %vm399_vm3, %v1065_v50  ;;  %676 = vrot.lane.b32.xlu0 %v1011_v29, %s910_s27  ;;  %vm679_vm8 = vcmask 785920   ;;  %vm685_vm9 = vcmask 1048320  }
 0x80f   : > { %675 = vst.msk [vmem:[%s1122_s6] sm:$0xff] %vm568_vm4, %v572_v21 }
 0x812   : > { %682 = vrot.lane.b32.xlu0 %v1072_v5, %s911_s9 }
 0x880   : > { %v677_v42 = vpop.permute.xlu0 %676 }
 0x881   : > { %680 = vst.msk [vmem:[%s1122_s6] sm:$0xff] %vm679_vm8, %v677_v42 }
 0x884   : > { %v683_v43 = vpop.permute.xlu0 %682 }
 0x885   : > { %686 = vst.msk [vmem:[%s1122_s6] sm:$0xff] %vm685_vm9, %v683_v43 }
 0x886 PF: > { %s17_s21 = sadd.s32 1, %s901_s21  }
 0x887   : > { %p14_p6 = scmp.ge.s32.totalorder %s17_s21, 10  }
 0x889   :  { %16 = sbr.rel (!%p14_p6) target bundleno = 1 (0x1), region = 86 }

</bundles_post_ra>
